<compile_context>
chip_gen: v7x
topology: tpu7x:2x2x1
jax: 0.10.0
libtpu: 0.0.40
codegen_flags: <defaults>
</compile_context>

<pallas_src>
import functools

import jax
import jax.numpy as jnp
from jax.experimental import pallas as pl
from jax.experimental.pallas import tpu as pltpu


def _round_up(n, m):
    return ((n + m - 1) // m) * m


def _moe_kernel(x_ref, w_ref, b_ref, o_ref, *, num_experts, gate_pad, c_pad):
    # Cast activations to bf16 for the MXU (weights already bf16 from wrapper).
    x = x_ref[...].astype(jnp.bfloat16)                        # (TB, D)

    # --- Single fused matmul: gate logits + all expert outputs, one bias add. ---
    fused = (
        jnp.dot(x, w_ref[...], preferred_element_type=jnp.float32)
        + b_ref[...]                                           # (1, N_fused) lane-aligned add
    )                                                          # (TB, N_fused) f32

    # --- Gate softmax over experts (f32 math). ---
    gate_logits = fused[:, :num_experts]                       # (TB, E)
    gate_logits = gate_logits - jnp.max(gate_logits, axis=-1, keepdims=True)
    gate_exp = jnp.exp(gate_logits)
    inv_denom = pl.reciprocal(
        jnp.sum(gate_exp, axis=-1, keepdims=True), approx=True
    )
    gate_weights = gate_exp * inv_denom                        # (TB, E) f32

    # --- Combine: statically unrolled lane-dense VPU multiply-adds. ---
    # Each expert block is a full 128-lane group starting at a lane-group
    # boundary (gate_pad + e * c_pad); padded lanes carry zeros.
    acc = gate_weights[:, 0:1] * fused[:, gate_pad:gate_pad + c_pad]
    for e in range(1, num_experts):
        start = gate_pad + e * c_pad
        acc = acc + gate_weights[:, e:e + 1] * fused[:, start:start + c_pad]

    o_ref[...] = acc                                           # (TB, c_pad) unmasked lane-dense store


def moe_forward(x, gate_w, gate_b, expert_w, expert_b, *, block_b=None):
    B, D = x.shape
    E = gate_w.shape[1]
    C = expert_w.shape[2]

    # Lane-group-aligned fused layout (built once, outside the kernel):
    #   cols [0, E)                           gate weights (zero-padded to gate_pad)
    #   cols [gate_pad + e*c_pad, ... + C)    expert e weights (zero-padded to c_pad)
    gate_pad = _round_up(E, 128)
    c_pad = _round_up(C, 128)
    n_fused = gate_pad + E * c_pad

    w_fused = jnp.zeros((D, n_fused), jnp.float32)
    b_fused = jnp.zeros((1, n_fused), jnp.float32)
    w_fused = w_fused.at[:, :E].set(gate_w)
    b_fused = b_fused.at[:, :E].set(gate_b.reshape(1, E))
    for e in range(E):
        start = gate_pad + e * c_pad
        w_fused = w_fused.at[:, start:start + C].set(expert_w[e])
        b_fused = b_fused.at[:, start:start + C].set(expert_b[e].reshape(1, C))

    # bf16 MXU weight operand (f32 accumulation in-kernel); bias stays f32.
    # TODO(synk): on v6e, int8 weight-only quantization of w_fused halves the
    # resident VMEM / DMA bytes (not portable to v7x's fp8-only MXU).
    w_fused_bf = w_fused.astype(jnp.bfloat16)

    if block_b is None:
        # Large row tiles amortize the ~0.35 us per-grid-step overhead; at the
        # toy size this collapses to a single grid step (block_b == B).
        block_b = min(B, 512)
    assert B % block_b == 0, "batch must be divisible by the row tile"
    assert block_b == B or block_b % 8 == 0, "row tile must be a multiple of 8"
    grid = (B // block_b,)

    # Explicit VMEM budget: double-buffered x / output tiles + resident
    # (default double-buffered) fused weight and bias, with headroom.
    vmem_bytes = (
        2 * block_b * D * 4          # x tiles (f32)
        + 2 * block_b * c_pad * 4    # output tiles (f32)
        + 2 * D * n_fused * 2        # fused weight (bf16)
        + 2 * n_fused * 4            # fused bias (f32)
    )
    vmem_limit = int(min(max(2 * vmem_bytes, 16 * 1024 * 1024), 100 * 1024 * 1024))

    # TODO(synk): for production MoE-head sizes, tile the fused weight over an
    # extra 'arbitrary' N (and, for large D, K) grid axis with a per-tile
    # combine so the resident block fits v7x's 64 MiB VMEM, and single-buffer
    # the constant-index_map weight specs (pipeline_mode=pl.Buffered(1)).
    kernel = functools.partial(
        _moe_kernel, num_experts=E, gate_pad=gate_pad, c_pad=c_pad
    )
    out_padded = pl.pallas_call(
        kernel,
        out_shape=jax.ShapeDtypeStruct((B, c_pad), jnp.float32),
        grid=grid,
        in_specs=[
            pl.BlockSpec((block_b, D), lambda i: (i, 0)),    # x: tiled over batch rows
            pl.BlockSpec((D, n_fused), lambda i: (0, 0)),    # fused gate+expert weights: resident
            pl.BlockSpec((1, n_fused), lambda i: (0, 0)),    # fused bias: resident
        ],
        out_specs=pl.BlockSpec((block_b, c_pad), lambda i: (i, 0)),
        compiler_params=pltpu.CompilerParams(
            dimension_semantics=("parallel",),
            vmem_limit_bytes=vmem_limit,
        ),
    )(x, w_fused_bf, b_fused)

    # Toy C=16: kernel stores a lane-dense (B, 128) slab; slice the real
    # classes out here.  At production sizes (C % 128 == 0) this is a no-op.
    return out_padded[:, :C]


def moe_reference(x, gate_w, gate_b, expert_w, expert_b):
    gate_logits = x @ gate_w + gate_b
    gate_weights = jax.nn.softmax(gate_logits, axis=1)
    expert_out = jnp.einsum("bd,edc->bec", x, expert_w) + expert_b[None]
    return jnp.sum(gate_weights[..., None] * expert_out, axis=1)


if __name__ == "__main__":
    # Shapes implied by the module: num_experts=4, d_model=32, num_classes=16.
    B, D, E, C = 64, 32, 4, 16

    key = jax.random.PRNGKey(0)
    kx, kgw, kgb, kew, keb = jax.random.split(key, 5)

    # Deterministic PyTorch-style init: U(-1/sqrt(fan_in), 1/sqrt(fan_in))
    bound = 1.0 / (D ** 0.5)
    x = jax.random.normal(kx, (B, D), dtype=jnp.float32)
    gate_w = jax.random.uniform(kgw, (D, E), minval=-bound, maxval=bound, dtype=jnp.float32)
    gate_b = jax.random.uniform(kgb, (1, E), minval=-bound, maxval=bound, dtype=jnp.float32)
    expert_w = jax.random.uniform(kew, (E, D, C), minval=-bound, maxval=bound, dtype=jnp.float32)
    expert_b = jax.random.uniform(keb, (E, C), minval=-bound, maxval=bound, dtype=jnp.float32)

    out = moe_forward(x, gate_w, gate_b, expert_w, expert_b)
    out = jax.block_until_ready(out)

    ref = moe_reference(x, gate_w, gate_b, expert_w, expert_b)
    assert out.shape == (B, C)
    # bf16 MXU operands + approx reciprocal => loosened (but still tight) tolerance.
    assert jnp.allclose(out, ref, atol=3e-2, rtol=3e-2), "mismatch vs reference"

    print("KERNEL_OK")
</pallas_src>

<mosaic_0001>
module attributes {stable_mosaic.version = 11 : i64} {
  func.func @_moe_kernel(%arg0: i32, %arg1: memref<64x32xf32, #tpu.memory_space<vmem>>, %arg2: memref<32x640xbf16, #tpu.memory_space<vmem>>, %arg3: memref<1x640xf32, #tpu.memory_space<vmem>>, %arg4: memref<64x128xf32, #tpu.memory_space<vmem>>) attributes {dimension_semantics = [#tpu.dimension_semantics<parallel>], iteration_bounds = array<i64: 1>, scalar_prefetch = 0 : i64, scratch_operands = 0 : i64, tpu.core_type = #tpu.core_type<tc>, window_params = [{transform_indices = @transform_0, window_bounds = array<i64: 64, 32>}, {pipeline_mode = #tpu.pipeline_mode<synchronous>, transform_indices = @transform_1, window_bounds = array<i64: 32, 640>}, {pipeline_mode = #tpu.pipeline_mode<synchronous>, transform_indices = @transform_2, window_bounds = array<i64: 1, 640>}, {transform_indices = @transform_3, window_bounds = array<i64: 64, 128>}]} {
    %c0 = arith.constant 0 : index
    %c0_0 = arith.constant 0 : index
    %0 = vector.load %arg1[%c0, %c0_0] : memref<64x32xf32, #tpu.memory_space<vmem>>, vector<64x32xf32>
    %1 = arith.truncf %0 : vector<64x32xf32> to vector<64x32xbf16>
    %c0_1 = arith.constant 0 : index
    %c0_2 = arith.constant 0 : index
    %2 = vector.load %arg2[%c0_1, %c0_2] : memref<32x640xbf16, #tpu.memory_space<vmem>>, vector<32x640xbf16>
    %cst = arith.constant dense<0.000000e+00> : vector<64x640xf32>
    %3 = tpu.matmul %1, %2, %cst {dimension_numbers = #tpu.dot_dimension_numbers<[1], [0], [0], [1], [0, 0, 1, 1], [], []>} : vector<64x32xbf16>, vector<32x640xbf16>, vector<64x640xf32> -> vector<64x640xf32>
    %c0_3 = arith.constant 0 : index
    %c0_4 = arith.constant 0 : index
    %4 = vector.load %arg3[%c0_3, %c0_4] : memref<1x640xf32, #tpu.memory_space<vmem>>, vector<1x640xf32>
    %5 = vector.broadcast %4 : vector<1x640xf32> to vector<64x640xf32>
    %6 = arith.addf %3, %5 : vector<64x640xf32>
    %7 = vector.extract_strided_slice %6 {offsets = [0, 0], sizes = [64, 4], strides = [1, 1]} : vector<64x640xf32> to vector<64x4xf32>
    %cst_5 = arith.constant dense<0xFF800000> : vector<64xf32>
    %8 = vector.multi_reduction <maximumf>, %7, %cst_5 [1] : vector<64x4xf32> to vector<64xf32>
    %9 = vector.shape_cast %8 : vector<64xf32> to vector<64x1xf32>
    %10 = vector.broadcast %9 : vector<64x1xf32> to vector<64x4xf32>
    %11 = arith.subf %7, %10 : vector<64x4xf32>
    %12 = math.exp %11 : vector<64x4xf32>
    %cst_6 = arith.constant dense<0.000000e+00> : vector<64xf32>
    %13 = vector.multi_reduction <add>, %12, %cst_6 [1] : vector<64x4xf32> to vector<64xf32>
    %14 = vector.shape_cast %13 : vector<64xf32> to vector<64x1xf32>
    %15 = tpu.reciprocal %14 {approx = true} : vector<64x1xf32> -> vector<64x1xf32>
    %16 = vector.broadcast %15 : vector<64x1xf32> to vector<64x4xf32>
    %17 = arith.mulf %12, %16 : vector<64x4xf32>
    %18 = vector.extract_strided_slice %17 {offsets = [0, 0], sizes = [64, 1], strides = [1, 1]} : vector<64x4xf32> to vector<64x1xf32>
    %19 = vector.extract_strided_slice %6 {offsets = [0, 128], sizes = [64, 128], strides = [1, 1]} : vector<64x640xf32> to vector<64x128xf32>
    %20 = vector.broadcast %18 : vector<64x1xf32> to vector<64x128xf32>
    %21 = arith.mulf %20, %19 : vector<64x128xf32>
    %22 = vector.extract_strided_slice %17 {offsets = [0, 1], sizes = [64, 1], strides = [1, 1]} : vector<64x4xf32> to vector<64x1xf32>
    %23 = vector.extract_strided_slice %6 {offsets = [0, 256], sizes = [64, 128], strides = [1, 1]} : vector<64x640xf32> to vector<64x128xf32>
    %24 = vector.broadcast %22 : vector<64x1xf32> to vector<64x128xf32>
    %25 = arith.mulf %24, %23 : vector<64x128xf32>
    %26 = arith.addf %21, %25 : vector<64x128xf32>
    %27 = vector.extract_strided_slice %17 {offsets = [0, 2], sizes = [64, 1], strides = [1, 1]} : vector<64x4xf32> to vector<64x1xf32>
    %28 = vector.extract_strided_slice %6 {offsets = [0, 384], sizes = [64, 128], strides = [1, 1]} : vector<64x640xf32> to vector<64x128xf32>
    %29 = vector.broadcast %27 : vector<64x1xf32> to vector<64x128xf32>
    %30 = arith.mulf %29, %28 : vector<64x128xf32>
    %31 = arith.addf %26, %30 : vector<64x128xf32>
    %32 = vector.extract_strided_slice %17 {offsets = [0, 3], sizes = [64, 1], strides = [1, 1]} : vector<64x4xf32> to vector<64x1xf32>
    %33 = vector.extract_strided_slice %6 {offsets = [0, 512], sizes = [64, 128], strides = [1, 1]} : vector<64x640xf32> to vector<64x128xf32>
    %34 = vector.broadcast %32 : vector<64x1xf32> to vector<64x128xf32>
    %35 = arith.mulf %34, %33 : vector<64x128xf32>
    %36 = arith.addf %31, %35 : vector<64x128xf32>
    %c0_7 = arith.constant 0 : index
    %c0_8 = arith.constant 0 : index
    %37 = vector.load %arg4[%c0_7, %c0_8] : memref<64x128xf32, #tpu.memory_space<vmem>>, vector<64x128xf32>
    tpu.vector_store %arg4[%c0_7, %c0_8], %36 {strides = array<i32>} : memref<64x128xf32, #tpu.memory_space<vmem>>, vector<64x128xf32>,
    return
  }
  func.func @transform_0(%arg0: i32) -> (i32, i32) {
    %c0_i32 = arith.constant 0 : i32
    %c0_i32_0 = arith.constant 0 : i32
    return %arg0, %c0_i32 : i32, i32
  }
  func.func @transform_1(%arg0: i32) -> (i32, i32) {
    %c0_i32 = arith.constant 0 : i32
    %c0_i32_0 = arith.constant 0 : i32
    %c0_i32_1 = arith.constant 0 : i32
    return %c0_i32, %c0_i32_0 : i32, i32
  }
  func.func @transform_2(%arg0: i32) -> (i32, i32) {
    %c0_i32 = arith.constant 0 : i32
    %c0_i32_0 = arith.constant 0 : i32
    %c0_i32_1 = arith.constant 0 : i32
    return %c0_i32, %c0_i32_0 : i32, i32
  }
  func.func @transform_3(%arg0: i32) -> (i32, i32) {
    %c0_i32 = arith.constant 0 : i32
    %c0_i32_0 = arith.constant 0 : i32
    return %arg0, %c0_i32 : i32, i32
  }
}

</mosaic_0001>

<bundles_post_ra>
// kernel: tpu_custom_call.1
= control target key start
LH: loop header
LB: loop body
LE: loop exit
PB: predicated region body
PF: predicated region fallthrough
CT: control target
= control target key end

     0   :  { %v799_v2 = vmov 0   ;;  %vm119_vm0 = vcmask 261120   ;;  %s1197_s0 = inlined_call_operand.vmem [shape: f32[64,32], index: 0, kind: input, shape index: {}]   ;;  %s1198_s1 = inlined_call_operand.vmem [shape: bf16[32,640], index: 1, kind: input, shape index: {}]   ;;  %s1199_s2 = inlined_call_operand.vmem [shape: f32[1,640], index: 2, kind: input, shape index: {}]   ;;  %s1200_s3 = inlined_call_operand.hbm [shape: f32[64,128], index: 3, kind: output, shape index: {}]  }
   0x1   :  { %v729_v0 = vld [vmem:[%s1198_s1 + $0x4] ss:$20 sps:$4 sm:$0xff]   ;;  %v731_v1 = vld [vmem:[%s1198_s1] ss:$20 sps:$4 sm:$0xff]   ;;  %164 = vmatprep.mubr.bf16.mxu0 %v799_v2  ;;  %194 = vmatprep.mubr.bf16.mxu1 %v799_v2  ;;  %v734_v4 = vld [vmem:[%s1198_s1 + $0x28] ss:$20 sps:$4 sm:$0xff]  }
   0x2   :  { %132 = vmatprep.subr.bf16.mxu0 %v729_v0  ;;  %v732_v3 = vld [vmem:[%s1198_s1 + $0x2c] ss:$20 sps:$4 sm:$0xff]   ;;  %688 = vmatprep.subr.bf16.mxu1 %v729_v0  ;;  %v22_v7 = vld [vmem:[%s1197_s0 + $0x30] sm:$0xff]  ;;  %v23_v8 = vld [vmem:[%s1197_s0 + $0x38] sm:$0xff] }
   0x3   :  { %133 = vmatpush1.bf16.msra.mxu0 %v731_v1  ;;  %v16_v5 = vld [vmem:[%s1197_s0] sm:$0xff]  ;;  %v17_v6 = vld [vmem:[%s1197_s0 + $0x8] sm:$0xff]  ;;  %690 = vmatpush1.bf16.msra.mxu1 %v731_v1  ;;  %v856_v10 = vpack.c.bf16 %v23_v8, %v22_v7 }
   0x4   :  { %134 = vmatprep.subr.bf16.mxu0 %v732_v3  ;;  %689 = vmatprep.subr.bf16.mxu1 %v732_v3  ;;  %v854_v9 = vpack.c.bf16 %v17_v6, %v16_v5 }
   0x5   :  { %699 = vset.pattern.permute.xlu0 %v799_v2  ;;  %700 = vset.pattern.permute.xlu1 %v799_v2 }
   0x7   :  { %135 = vmatpush1.bf16.msra.mxu0 %v734_v4  ;;  %691 = vmatpush1.bf16.msra.mxu1 %v734_v4 }
   0x8   :  { %8 = vsyncpa [#allocation3], 0  ;;  %v18_v11 = vld [vmem:[%s1197_s0 + $0x10] sm:$0xff]  ;;  %v19_v12 = vld [vmem:[%s1197_s0 + $0x18] sm:$0xff]  ;;  %v42_v17 = vlaneseq  ;;  %vm343_vm1 = vcmask 31744  }
   0x9   :  { %v870_v13 = vpack.c.bf16 %v19_v12, %v18_v11  ;;  %v20_v14 = vld [vmem:[%s1197_s0 + $0x20] sm:$0xff]  ;;  %v21_v15 = vld [vmem:[%s1197_s0 + $0x28] sm:$0xff] }
   0xa   :  { %658 = vmatmul.mubr.msk.bf16.vlgmr.msra.gmra.mrb[0].mxu0 %vm119_vm0, %v854_v9  ;;  %661 = vmatmul.mubr.msk.bf16.vlgmr.msra.gmra.mrb[0].mxu1 %vm119_vm0, %v856_v10  ;;  %v881_v16 = vpack.c.bf16 %v21_v15, %v20_v14  ;;  %v887_v18 = vshrl.u32 %v42_v17, 7  ;;  %v893_v20 = vld [vmem:[%s1199_s2] sm:$0x1f]  ;;  %v735_v59 = vld [vmem:[%s1198_s1 + $0x8] ss:$20 sps:$4 sm:$0xff]  }
   0xb   :  { %174 = vmatprep.mubr.bf16.mxu0 %v799_v2  ;;  %237 = vmatprep.mubr.bf16.mxu1 %v799_v2  ;;  %v737_v60 = vld [vmem:[%s1198_s1 + $0xc] ss:$20 sps:$4 sm:$0xff]   ;;  %v740_v61 = vld [vmem:[%s1198_s1 + $0x34] ss:$20 sps:$4 sm:$0xff]   ;;  %v741_v62 = vld [vmem:[%s1198_s1 + $0x10] ss:$20 sps:$4 sm:$0xff]  }
   0xc   :  { %v44_v19 = vsub.s32 0, %v887_v18  ;;  %v48_v22 = vsub.s32 1, %v887_v18  ;;  %v742_v63 = vld [vmem:[%s1198_s1 + $0x38] ss:$20 sps:$4 sm:$0xff]   ;;  %205 = vmatprep.subr.bf16.mxu1 %v737_v60  ;;  %v738_v0 = vld [vmem:[%s1198_s1 + $0x30] ss:$20 sps:$4 sm:$0xff]   ;;  %676 = vmatprep.subr.bf16.mxu0 %v741_v62 }
   0xd   :  { %206 = vmatpush1.bf16.msra.mxu1 %v735_v59  ;;  %677 = vmatpush3.bf16.msra.mxu0 %v741_v62  ;;  %v52_v59 = vsub.s32 2, %v887_v18  ;;  %v56_v62 = vsub.s32 3, %v887_v18  ;;  %s803_s1 = smov [#allocation2]  }
   0xe   :  { %v45_v21 = vrot.slane %v893_v20, %v44_v19  ;;  %v904_v28 = vrot.slane %v893_v20, %v48_v22  ;;  %207 = vmatprep.subr.bf16.mxu1 %v740_v61  ;;  %678 = vmatprep.subr.bf16.mxu0 %v742_v63  ;;  %v800_v61 = vmov 1   ;;  %s637_s21 = sshll.u32 %s803_s1, 4  ;;  %s638_s21 = int_to_ptr.vmem [resolvable:$true] %s637_s21 }
   0xf   :  { %s775_s22 = scalar_lea.vmem %s638_s21, 1024  ;;  %p780_p1 = scmp.lt.s32.totalorder %s638_s21, %s638_s21 }
  0x10   :  { %p776_p0 = scmp.ne.s32.totalorder %s638_s21, %s775_s22  ;;  %p781_p2 = scmp.lt.s32.totalorder %s775_s22, %s775_s22 }
  0x11   :  { %208 = vmatpush1.bf16.msra.mxu1 %v738_v0  ;;  %679 = vmatpush3.bf16.msra.mxu0 %v742_v63 }
  0x12   :  { %659 = vmatmul.mubr.msk.bf16.gmra.mrb[4].mxu0 %vm119_vm0, %v870_v13  ;;  %p782_p3 = por %p781_p2, %p780_p1 }
  0x13   :  { %184 = vmatprep.mubr.bf16.mxu0 %v799_v2 }
  0x14   :  { %662 = vmatmul.mubr.msk.bf16.vlgmr.msra.gmra.mrb[4].mxu1 %vm119_vm0, %v854_v9  ;;  %p783_p4 = pnand %p782_p3, %p776_p0 }
  0x15   :  { %247 = vmatprep.mubr.bf16.mxu1 %v799_v2 }
  0x1a   :  { %660 = vmatmul.mubr.msk.bf16.gmra.mrb[8].mxu0 %vm119_vm0, %v881_v16 }
  0x1b   :  { %680 = vmatprep.mubr.msk.bf16.mxu0 %vm119_vm0, %v854_v9 }
  0x1c   :  { %663 = vmatmul.mubr.msk.bf16.gmra.mrb[8].mxu1 %vm119_vm0, %v870_v13 }
  0x1d   :  { %257 = vmatprep.mubr.bf16.mxu1 %v799_v2 }
  0x22   :  { %681 = vmatmul.mubr.msk.bf16.vlgmr.msra.gmra.mrb[12].mxu0 %vm119_vm0, %v870_v13 }
  0x23   :  { %684 = vmatprep.mubr.msk.bf16.mxu0 %vm119_vm0, %v881_v16 }
  0x24   :  { %664 = vmatmul.mubr.msk.bf16.gmra.mrb[12].mxu1 %vm119_vm0, %v881_v16 }
  0x25   :  { %267 = vmatprep.mubr.bf16.mxu1 %v799_v2 }
  0x2a   :  { %685 = vmatmul.mubr.msk.bf16.gmra.mrb[16].mxu0 %vm119_vm0, %v856_v10 }
  0x2c   :  { %665 = vmatmul.mubr.msk.bf16.gmra.mrb[16].mxu1 %vm119_vm0, %v856_v10 }
  0xdd   :  { %v166_v23 = vpop.f32.mrb[0].mxu0  ;;  %v196_v24 = vpop.f32.mrb[0].mxu1 }
  0xde   :  { %v897_v25 = vadd.f32 %v166_v23, %v45_v21  ;;  %v899_v26 = vpop.f32.mrb[1].mxu0  ;;  %v901_v27 = vpop.f32.mrb[1].mxu1  ;;  %v931_v48 = vadd.f32 %v196_v24, %v45_v21 }
  0xdf   :  { %v170_v29 = vpop.f32.mrb[2].mxu0  ;;  %v200_v30 = vpop.f32.mrb[2].mxu1 }
  0xe0   :  { %v906_v31 = vadd.f32 %v170_v29, %v45_v21  ;;  %v908_v32 = vpop.f32.mrb[3].mxu0  ;;  %v344_v33 = vsel %vm343_vm1, %v897_v25, -inf  ;;  %v202_v34 = vpop.f32.mrb[3].mxu1  ;;  %v201_v55 = vadd.f32 %v200_v30, %v45_v21  ;;  %v362_v57 = vsel %vm343_vm1, %v931_v48, -inf }
  0xe1   :  { %345 = vmax.xlane.f32.xlu0 %v344_v33  ;;  %v913_v35 = vadd.f32 %v202_v34, %v904_v28 }
  0xe2   :  { %v347_v36 = vsel %vm343_vm1, %v906_v31, -inf  ;;  %v365_v58 = vsel %vm343_vm1, %v201_v55, -inf }
  0xe5   :  { %v176_v37 = vpop.f32.mrb[4].mxu0  ;;  %348 = vmax.xlane.f32.xlu0 %v347_v36 }
  0xe6   :  { %v917_v38 = vadd.f32 %v176_v37, %v45_v21  ;;  %v919_v39 = vpop.f32.mrb[5].mxu0 }
  0xe7   :  { %v180_v40 = vpop.f32.mrb[6].mxu0 }
  0xe8   :  { %v921_v41 = vadd.f32 %v180_v40, %v45_v21  ;;  %v923_v42 = vpop.f32.mrb[7].mxu0  ;;  %v350_v43 = vsel %vm343_vm1, %v917_v38, -inf }
  0xe9   :  { %351 = vmax.xlane.f32.xlu1 %v350_v43 }
  0xea   :  { %v353_v44 = vsel %vm343_vm1, %v921_v41, -inf }
  0xed   :  { %v186_v45 = vpop.f32.mrb[8].mxu0  ;;  %354 = vmax.xlane.f32.xlu1 %v353_v44 }
  0xee   :  { %v929_v46 = vadd.f32 %v186_v45, %v45_v21  ;;  %v188_v47 = vpop.f32.mrb[9].mxu0 }
  0xef   :  { %v934_v49 = vadd.f32 %v188_v47, %v904_v28  ;;  %v190_v50 = vpop.f32.mrb[10].mxu0 }
  0xf0   :  { %v936_v51 = vadd.f32 %v190_v50, %v45_v21  ;;  %v192_v52 = vpop.f32.mrb[11].mxu0  ;;  %v356_v53 = vsel %vm343_vm1, %v929_v46, -inf }
  0xf1   :  { %v941_v54 = vadd.f32 %v192_v52, %v904_v28  ;;  %357 = vmax.xlane.f32.xlu0 %v356_v53 }
  0xf2   :  { %v359_v56 = vsel %vm343_vm1, %v936_v51, -inf }
  0xf3   :  { %360 = vmax.xlane.f32.xlu1 %v359_v56  ;;  %v1019_v56 = vpop.f32.mrb[4].mxu1 }
  0xf5   :  { %363 = vmax.xlane.f32.xlu0 %v362_v57  ;;  %v1021_v57 = vpop.f32.mrb[5].mxu1 }
  0xf7   :  { %366 = vmax.xlane.f32.xlu1 %v365_v58  ;;  %v1023_v58 = vpop.f32.mrb[6].mxu1 }
  0xf8   :  { %v1026_v60 = vpop.f32.mrb[7].mxu1 }
  0xf9   :  { %v1030_v63 = vpop.f32.mrb[8].mxu1 }
  0xfa   :  { %v1032_v0 = vpop.f32.mrb[9].mxu1 }
 0x16e   :  { %v346_v1 = vpop.xlane.xlu0 %345 }
 0x16f   :  { %v368_v3 = vsub.f32 %v897_v25, %v346_v1 }
 0x171   :  { %v376_v4 = vmul.f32 1.442695, %v368_v3  ;;  %v1034_v3 = vpop.f32.mrb[10].mxu1 }
 0x172   :  { %v349_v5 = vpop.xlane.xlu0 %348 }
 0x173   :  { %743 = vpow2.f32 %v376_v4  ;;  %v369_v6 = vsub.f32 %v906_v31, %v349_v5  ;;  %v1037_v4 = vrot.slane %v893_v20, %v52_v59  ;;  %v1039_v5 = vpop.f32.mrb[11].mxu1 }
 0x175   :  { %v378_v7 = vmul.f32 1.442695, %v369_v6  ;;  %v1042_v6 = vrot.slane %v893_v20, %v56_v62 }
 0x176   :  { %v352_v8 = vpop.xlane.xlu1 %351 }
 0x177   :  { %745 = vpow2.f32 %v378_v7  ;;  %v370_v14 = vsub.f32 %v917_v38, %v352_v8  ;;  %v259_v7 = vpop.f32.mrb[12].mxu1 }
 0x178   :  { %v1045_v8 = vadd.f32 %v259_v7, %v1037_v4 }
 0x179   :  { %v380_v22 = vmul.f32 1.442695, %v370_v14 }
 0x17a   :  { %v355_v9 = vpop.xlane.xlu1 %354 }
 0x17b   :  { %v371_v19 = vsub.f32 %v921_v41, %v355_v9  ;;  %v261_v9 = vpop.f32.mrb[13].mxu1 }
 0x17d   :  { %v744_v11 = vpop.eup %743  ;;  %v382_v30 = vmul.f32 1.442695, %v371_v19 }
 0x17e   :  { %v358_v12 = vpop.xlane.xlu0 %357  ;;  %v392_v13 = vsel %vm343_vm1, %v744_v11, 0.0 }
 0x17f   :  { %393 = vadd.xlane.f32.xlu0 %v392_v13  ;;  %v372_v24 = vsub.f32 %v929_v46, %v358_v12  ;;  %v263_v12 = vpop.f32.mrb[14].mxu1 }
 0x180   :  { %v361_v10 = vpop.xlane.xlu1 %360  ;;  %v1051_v13 = vadd.f32 %v263_v12, %v1037_v4  ;;  %v265_v14 = vpop.f32.mrb[15].mxu1 }
 0x181   :  { %v987_v15 = vpop.eup %745  ;;  %v373_v31 = vsub.f32 %v936_v51, %v361_v10  ;;  %v384_v34 = vmul.f32 1.442695, %v372_v24  ;;  %v801_v24 = vmov 2  }
 0x182   :  { %v364_v16 = vpop.xlane.xlu0 %363  ;;  %v395_v17 = vsel %vm343_vm1, %v987_v15, 0.0 }
 0x183   :  { %v374_v21 = vsub.f32 %v931_v48, %v364_v16  ;;  %396 = vadd.xlane.f32.xlu1 %v395_v17  ;;  %v386_v36 = vmul.f32 1.442695, %v373_v31  ;;  %v1054_v16 = vadd.f32 %v265_v14, %v1042_v6  ;;  %v1056_v17 = vpop.f32.mrb[16].mxu1 }
 0x184   :  { %v367_v23 = vpop.xlane.xlu1 %366 }
 0x185   :  { %v388_v25 = vmul.f32 1.442695, %v374_v21  ;;  %v375_v29 = vsub.f32 %v201_v55, %v367_v23 }
 0x187   :  { %747 = vpow2.f32 %v388_v25  ;;  %v390_v33 = vmul.f32 1.442695, %v375_v29 }
 0x188   :  { %749 = vpow2.f32 %v380_v22 }
 0x189   :  { %751 = vpow2.f32 %v390_v33 }
 0x18a   :  { %753 = vpow2.f32 %v382_v30  ;;  %v1066_v30 = vpop.f32.mrb[17].mxu1 }
 0x18b   :  { %755 = vpow2.f32 %v384_v34 }
 0x18c   :  { %757 = vpow2.f32 %v386_v36  ;;  %v273_v36 = vpop.f32.mrb[18].mxu1 }
 0x191   :  { %v748_v37 = vpop.eup %747 }
 0x192   :  { %v995_v38 = vpop.eup %749  ;;  %v410_v40 = vsel %vm343_vm1, %v748_v37, 0.0 }
 0x193   :  { %v998_v41 = vpop.eup %751  ;;  %411 = vadd.xlane.f32.xlu0 %v410_v40  ;;  %v398_v45 = vsel %vm343_vm1, %v995_v38, 0.0  ;;  %v1075_v40 = vadd.f32 %v273_v36, %v1037_v4  ;;  %v272_v36 = vadd.f32 %v1066_v30, %v1042_v6  ;;  %v244_v30 = vadd.f32 %v1023_v58, %v1037_v4 }
 0x194   :  { %v413_v43 = vsel %vm343_vm1, %v998_v41, 0.0  ;;  %v1002_v44 = vpop.eup %753  ;;  %v246_v58 = vadd.f32 %v1026_v60, %v1042_v6 }
 0x195   :  { %414 = vadd.xlane.f32.xlu1 %v413_v43  ;;  %v1006_v46 = vpop.eup %755  ;;  %v401_v47 = vsel %vm343_vm1, %v1002_v44, 0.0  ;;  %v275_v43 = vpop.f32.mrb[19].mxu1 }
 0x196   :  { %v1010_v48 = vpop.eup %757  ;;  %v404_v50 = vsel %vm343_vm1, %v1006_v46, 0.0 }
 0x197   :  { %399 = vadd.xlane.f32.xlu0 %v398_v45  ;;  %v407_v51 = vsel %vm343_vm1, %v1010_v48, 0.0 }
 0x199   :  { %402 = vadd.xlane.f32.xlu1 %v401_v47  ;;  %v1083_v47 = vadd.f32 %v275_v43, %v1042_v6 }
 0x19b   :  { %405 = vadd.xlane.f32.xlu0 %v404_v50  ;;  %v802_v50 = vmov 3  }
 0x19d   :  { %408 = vadd.xlane.f32.xlu1 %v407_v51 }
 0x20c   :  { %v394_v52 = vpop.xlane.xlu0 %393 }
 0x20d   :  { %759 = vrcp.f32 %v394_v52 }
 0x210   :  { %v397_v10 = vpop.xlane.xlu1 %396 }
 0x217   :  { %v760_v53 = vpop.eup %759 }
 0x218   :  { %v1016_v55 = vmul.f32 %v760_v53, %v744_v11  ;;  %v1048_v11 = vadd.f32 %v261_v9, %v1042_v6 }
 0x21a   :  { %434 = vperm.xlu0 %699, %v1016_v55  }
 0x21e   :  { %702 = vset.pattern.permute.xlu0 %v800_v61 }
 0x220   :  { %v412_v1 = vpop.xlane.xlu0 %411 }
 0x221   :  { %761 = vrcp.f32 %v412_v1 }
 0x222   :  { %763 = vrcp.f32 %v397_v10  ;;  %v415_v21 = vpop.xlane.xlu1 %414  ;;  %v270_v10 = vadd.f32 %v1056_v17, %v1037_v4 }
 0x223   :  { %765 = vrcp.f32 %v415_v21 }
 0x224   :  { %v400_v23 = vpop.xlane.xlu0 %399 }
 0x226   :  { %v403_v29 = vpop.xlane.xlu1 %402 }
 0x227   :  { %767 = vrcp.f32 %v403_v29  ;;  %v242_v29 = vadd.f32 %v1021_v57, %v1042_v6 }
 0x228   :  { %v406_v34 = vpop.xlane.xlu0 %405 }
 0x229   :  { %769 = vrcp.f32 %v406_v34 }
 0x22a   :  { %v409_v53 = vpop.xlane.xlu1 %408  ;;  %771 = vrcp.f32 %v400_v23  ;;  %v240_v23 = vadd.f32 %v1019_v56, %v1037_v4 }
 0x22b   :  { %v762_v19 = vpop.eup %761  ;;  %773 = vrcp.f32 %v409_v53 }
 0x22c   :  { %v1058_v22 = vmul.f32 %v762_v19, %v748_v37  ;;  %v764_v25 = vpop.eup %763  ;;  %v1072_v37 = vpop.f32.mrb[12].mxu0  ;;  %v199_v19 = vadd.f32 %v901_v27, %v904_v28 }
 0x22d   :  { %v425_v31 = vmul.f32 %v764_v25, %v987_v15  ;;  %v766_v33 = vpop.eup %765  ;;  %v1077_v45 = vpop.f32.mrb[13].mxu0  ;;  %v169_v25 = vadd.f32 %v899_v26, %v904_v28 }
 0x22e   :  { %505 = vperm.xlu0 %702, %v1058_v22   ;;  %464 = vperm.xlu1 %700, %v1058_v22   ;;  %v1080_v15 = vmul.f32 %v766_v33, %v998_v41  ;;  %v1088_v51 = vpop.f32.mrb[14].mxu0 }
 0x22f   :  { %v1090_v52 = vpop.f32.mrb[15].mxu0 }
 0x230   :  { %v1100_v1 = vpop.f32.mrb[16].mxu0 }
 0x231   :  { %v768_v41 = vpop.eup %767 }
 0x232   :  { %703 = vset.pattern.permute.xlu0 %v801_v24  ;;  %701 = vset.pattern.permute.xlu1 %v800_v61  ;;  %v427_v59 = vmul.f32 %v768_v41, %v1002_v44  ;;  %v1102_v44 = vpop.f32.mrb[17].mxu0 }
 0x233   :  { %529 = vperm.xlu0 %703, %v1016_v55   ;;  %481 = vperm.xlu1 %701, %v1016_v55   ;;  %v770_v62 = vpop.eup %769 }
 0x234   :  { %v772_v7 = vpop.eup %771 }
 0x235   :  { %v774_v9 = vpop.eup %773  ;;  %v426_v12 = vmul.f32 %v772_v7, %v995_v38  ;;  %v1118_v38 = vpop.f32.mrb[18].mxu0 }
 0x237   :  { %707 = vset.pattern.permute.xlu0 %v800_v61  ;;  %704 = vset.pattern.permute.xlu1 %v801_v24 }
 0x238   :  { %485 = vperm.xlu0 %707, %v425_v31   ;;  %553 = vperm.xlu1 %704, %v1058_v22  }
 0x23c   :  { %710 = vset.pattern.permute.xlu0 %v801_v24  ;;  %705 = vset.pattern.permute.xlu1 %v802_v50 }
 0x23d   :  { %557 = vperm.xlu0 %710, %v1080_v15   ;;  %577 = vperm.xlu1 %705, %v1016_v55   ;;  %v428_v55 = vmul.f32 %v770_v62, %v1006_v46  ;;  %v429_v46 = vmul.f32 %v774_v9, %v1010_v48  ;;  %v1120_v48 = vpop.f32.mrb[19].mxu0 }
 0x241   :  { %711 = vset.pattern.permute.xlu0 %v802_v50  ;;  %706 = vset.pattern.permute.xlu1 %v799_v2 }
 0x242   :  { %581 = vperm.xlu0 %711, %v425_v31   ;;  %439 = vperm.xlu1 %706, %v425_v31  }
 0x246   :  { %718 = vset.pattern.permute.xlu0 %v801_v24  ;;  %469 = vperm.xlu1 %706, %v1080_v15  }
 0x247   :  { %541 = vperm.xlu0 %718, %v427_v59  }
 0x24a   :  { %708 = vset.pattern.permute.xlu1 %v800_v61 }
 0x24b   :  { %721 = vset.pattern.permute.xlu0 %v800_v61  ;;  %509 = vperm.xlu1 %708, %v1080_v15  }
 0x24c   :  { %497 = vperm.xlu0 %721, %v428_v55  }
 0x24f   :  { %709 = vset.pattern.permute.xlu1 %v801_v24 }
 0x250   :  { %533 = vperm.xlu1 %709, %v425_v31   ;;  %723 = vset.pattern.permute.xlu0 %v802_v50  ;;  %v60_v31 = vsub.s32 4, %v887_v18 }
 0x251   :  { %593 = vperm.xlu0 %723, %v428_v55  }
 0x252   :  { %v1137_v56 = vrot.slane %v893_v20, %v60_v31  ;;  %v173_v20 = vadd.f32 %v908_v32, %v904_v28 }
 0x254   :  { %712 = vset.pattern.permute.xlu1 %v799_v2  ;;  %v313_v57 = vadd.f32 %v1077_v45, %v1137_v56  ;;  %v316_v32 = vadd.f32 %v1090_v52, %v1137_v56  ;;  %v337_v60 = vadd.f32 %v1100_v1, %v1137_v56  ;;  %v179_v52 = vadd.f32 %v919_v39, %v904_v28 }
 0x255   :  { %444 = vperm.xlu1 %712, %v426_v12   ;;  %726 = vset.pattern.permute.xlu0 %v801_v24 }
 0x256   :  { %549 = vperm.xlu0 %726, %v429_v46  }
 0x259   :  { %713 = vset.pattern.permute.xlu1 %v800_v61 }
 0x25a   :  { %489 = vperm.xlu1 %713, %v426_v12   ;;  %728 = vset.pattern.permute.xlu0 %v802_v50 }
 0x25b   :  { %601 = vperm.xlu0 %728, %v1058_v22  }
 0x25e   :  { %714 = vset.pattern.permute.xlu1 %v801_v24 }
 0x25f   :  { %537 = vperm.xlu1 %714, %v426_v12  }
 0x263   :  { %715 = vset.pattern.permute.xlu1 %v802_v50 }
 0x264   :  { %585 = vperm.xlu1 %715, %v426_v12  }
 0x268   :  { %716 = vset.pattern.permute.xlu1 %v799_v2 }
 0x269   :  { %449 = vperm.xlu1 %716, %v427_v59  }
 0x26d   :  { %717 = vset.pattern.permute.xlu1 %v800_v61 }
 0x26e   :  { %493 = vperm.xlu1 %717, %v427_v59  }
 0x272   :  { %719 = vset.pattern.permute.xlu1 %v802_v50 }
 0x273   :  { %589 = vperm.xlu1 %719, %v427_v59  }
 0x277   :  { %720 = vset.pattern.permute.xlu1 %v799_v2 }
 0x278   :  { %454 = vperm.xlu1 %720, %v428_v55  }
 0x27c   :  { %722 = vset.pattern.permute.xlu1 %v801_v24 }
 0x27d   :  { %545 = vperm.xlu1 %722, %v428_v55  }
 0x281   :  { %724 = vset.pattern.permute.xlu1 %v799_v2 }
 0x282   :  { %459 = vperm.xlu1 %724, %v429_v46  }
 0x286   :  { %725 = vset.pattern.permute.xlu1 %v800_v61 }
 0x287   :  { %501 = vperm.xlu1 %725, %v429_v46  }
 0x28b   :  { %727 = vset.pattern.permute.xlu1 %v802_v50 }
 0x28c   :  { %597 = vperm.xlu1 %727, %v429_v46  }
 0x290   :  { %605 = vperm.xlu1 %727, %v1080_v15  }
 0x299   :  { %v435_v14 = vpop.permute.xlu0 %434 }
 0x29a   :  { %v472_v34 = vmul.f32 %v435_v14, %v169_v25 }
 0x2ad   :  { %v465_v2 = vpop.permute.xlu1 %464  ;;  %v506_v21 = vpop.permute.xlu0 %505 }
 0x2ae   :  { %v478_v22 = vmul.f32 %v465_v2, %v199_v19  ;;  %v518_v61 = vmul.f32 %v506_v21, %v270_v10 }
 0x2b0   :  { %v526_v24 = vadd.f32 %v518_v61, %v478_v22 }
 0x2b2   :  { %v482_v17 = vpop.permute.xlu1 %481  ;;  %v530_v33 = vpop.permute.xlu0 %529 }
 0x2b3   :  { %v512_v27 = vmul.f32 %v482_v17, %v240_v23  ;;  %v560_v15 = vmul.f32 %v530_v33, %v242_v29 }
 0x2b5   :  { %v520_v43 = vadd.f32 %v512_v27, %v472_v34 }
 0x2b7   :  { %v568_v50 = vadd.f32 %v560_v15, %v520_v43  ;;  %v554_v41 = vpop.permute.xlu1 %553  ;;  %v486_v26 = vpop.permute.xlu0 %485 }
 0x2b8   :  { %v566_v53 = vmul.f32 %v554_v41, %v272_v36  ;;  %v513_v14 = vmul.f32 %v486_v26, %v244_v30  ;;  %v252_v41 = vadd.f32 %v1032_v0, %v1042_v6  ;;  %v183_v0 = vadd.f32 %v923_v42, %v904_v28 }
 0x2ba   :  { %v574_v18 = vadd.f32 %v566_v53, %v526_v24 }
 0x2bc   :  { %v578_v59 = vpop.permute.xlu1 %577  ;;  %v558_v62 = vpop.permute.xlu0 %557 }
 0x2bd   :  { %v608_v55 = vmul.f32 %v578_v59, %v313_v57  ;;  %v567_v7 = vmul.f32 %v558_v62, %v1083_v47  ;;  %v321_v62 = vadd.f32 %v1072_v37, %v1137_v56  ;;  %v324_v37 = vadd.f32 %v1088_v51, %v1137_v56 }
 0x2bf   :  { %v616_v9 = vadd.f32 %v608_v55, %v568_v50 }
 0x2c1   :  { %624 = vst [vmem:[#allocation2] sm:$0xff] %v616_v9  ;;  %v440_v12 = vpop.permute.xlu1 %439  ;;  %v582_v46 = vpop.permute.xlu0 %581  ;;  %v254_v9 = vadd.f32 %v1034_v3, %v1037_v4 }
 0x2c2   :  { %v473_v10 = vmul.f32 %v440_v12, %v173_v20  ;;  %v609_v17 = vmul.f32 %v582_v46, %v316_v32 }
 0x2c4   :  { %v521_v19 = vadd.f32 %v513_v14, %v473_v10 }
 0x2c5   :  { %v470_v45 = vpop.permute.xlu1 %469 }
 0x2c6   :  { %v479_v2 = vmul.f32 %v470_v45, %v913_v35  ;;  %v542_v21 = vpop.permute.xlu0 %541 }
 0x2ca   :  { %v510_v22 = vpop.permute.xlu1 %509 }
 0x2cb   :  { %v519_v47 = vmul.f32 %v510_v22, %v1075_v40  ;;  %v498_v61 = vpop.permute.xlu0 %497  ;;  %v250_v40 = vadd.f32 %v1030_v63, %v1037_v4 }
 0x2cc   :  { %v516_v4 = vmul.f32 %v498_v61, %v1045_v8 }
 0x2cd   :  { %v527_v23 = vadd.f32 %v519_v47, %v479_v2 }
 0x2cf   :  { %v534_v24 = vpop.permute.xlu1 %533  ;;  %v1152_v25 = vadd.f32 %v567_v7, %v527_v23 }
 0x2d0   :  { %v561_v29 = vmul.f32 %v534_v24, %v246_v58  ;;  %v594_v31 = vpop.permute.xlu0 %593 }
 0x2d2   :  { %v569_v33 = vadd.f32 %v561_v29, %v521_v19 }
 0x2d4   :  { %v617_v35 = vadd.f32 %v609_v17, %v569_v33  ;;  %v445_v34 = vpop.permute.xlu1 %444 }
 0x2d5   :  { %v550_v27 = vpop.permute.xlu0 %549  ;;  %v474_v43 = vmul.f32 %v445_v34, %v179_v52 }
 0x2d6   :  { %625 = vst [vmem:[#allocation2 + $0x8] sm:$0xff] %v617_v35  ;;  %v565_v8 = vmul.f32 %v550_v27, %v1054_v16 }
 0x2d9   :  { %v490_v36 = vpop.permute.xlu1 %489 }
 0x2da   :  { %v514_v15 = vmul.f32 %v490_v36, %v250_v40  ;;  %v602_v50 = vpop.permute.xlu0 %601 }
 0x2db   :  { %v614_v26 = vmul.f32 %v602_v50, %v337_v60 }
 0x2dc   :  { %v522_v53 = vadd.f32 %v514_v15, %v474_v43 }
 0x2dd   :  { %v622_v57 = vadd.f32 %v614_v26, %v574_v18  ;;  %v256_v18 = vadd.f32 %v1039_v5, %v1042_v6  ;;  %v329_v5 = vadd.f32 %v1102_v44, %v1137_v56 }
 0x2de   :  { %v538_v59 = vpop.permute.xlu1 %537 }
 0x2df   :  { %630 = vst [vmem:[#allocation2 + $0x30] sm:$0xff] %v622_v57  ;;  %v562_v63 = vmul.f32 %v538_v59, %v252_v41  ;;  %v563_v14 = vmul.f32 %v542_v21, %v256_v18  ;;  %v612_v51 = vmul.f32 %v594_v31, %v329_v5 }
 0x2e1   :  { %v570_v1 = vadd.f32 %v562_v63, %v522_v53 }
 0x2e3   :  { %v586_v55 = vpop.permute.xlu1 %585 }
 0x2e4   :  { %v610_v7 = vmul.f32 %v586_v55, %v321_v62 }
 0x2e6   :  { %v618_v39 = vadd.f32 %v610_v7, %v570_v1 }
 0x2e8   :  { %626 = vst [vmem:[#allocation2 + $0x10] sm:$0xff] %v618_v39  ;;  %v450_v30 = vpop.permute.xlu1 %449 }
 0x2e9   :  { %v475_v12 = vmul.f32 %v450_v30, %v183_v0 }
 0x2ed   :  { %v494_v20 = vpop.permute.xlu1 %493 }
 0x2ee   :  { %v515_v46 = vmul.f32 %v494_v20, %v254_v9 }
 0x2f0   :  { %v523_v10 = vadd.f32 %v515_v46, %v475_v12 }
 0x2f2   :  { %v590_v19 = vpop.permute.xlu1 %589  ;;  %v571_v45 = vadd.f32 %v563_v14, %v523_v10 }
 0x2f3   :  { %v611_v2 = vmul.f32 %v590_v19, %v324_v37 }
 0x2f5   :  { %v619_v22 = vadd.f32 %v611_v2, %v571_v45 }
 0x2f7   :  { %627 = vst [vmem:[#allocation2 + $0x18] sm:$0xff] %v619_v22  ;;  %v455_v3 = vpop.permute.xlu1 %454 }
 0x2f8   :  { %v476_v28 = vmul.f32 %v455_v3, %v934_v49  ;;  %v332_v49 = vadd.f32 %v1120_v48, %v1137_v56 }
 0x2fa   :  { %v524_v42 = vadd.f32 %v516_v4, %v476_v28 }
 0x2fc   :  { %v546_v6 = vpop.permute.xlu1 %545 }
 0x2fd   :  { %v564_v47 = vmul.f32 %v546_v6, %v1048_v11  ;;  %v340_v11 = vadd.f32 %v1118_v38, %v1137_v56 }
 0x2ff   :  { %v572_v21 = vadd.f32 %v564_v47, %v524_v42 }
 0x301   :  { %v620_v58 = vadd.f32 %v612_v51, %v572_v21  ;;  %v460_v23 = vpop.permute.xlu1 %459 }
 0x302   :  { %v477_v24 = vmul.f32 %v460_v23, %v941_v54 }
 0x303   :  { %628 = vst [vmem:[#allocation2 + $0x20] sm:$0xff] %v620_v58 }
 0x306   :  { %v502_v32 = vpop.permute.xlu1 %501 }
 0x307   :  { %v517_v29 = vmul.f32 %v502_v32, %v1051_v13 }
 0x309   :  { %v525_v61 = vadd.f32 %v517_v29, %v477_v24 }
 0x30b   :  { %v598_v44 = vpop.permute.xlu1 %597  ;;  %v573_v17 = vadd.f32 %v565_v8, %v525_v61 }
 0x30c   :  { %v613_v33 = vmul.f32 %v598_v44, %v332_v49 }
 0x30e   :  { %v621_v31 = vadd.f32 %v613_v33, %v573_v17 }
 0x30f   :  { %v606_v35 = vpop.permute.xlu1 %605 }
 0x310   :  { %629 = vst [vmem:[#allocation2 + $0x28] sm:$0xff] %v621_v31  ;;  %v615_v54 = vmul.f32 %v606_v35, %v340_v11 }
 0x312   :  { %v623_v13 = vadd.f32 %v615_v54, %v1152_v25 }
 0x314   :  { %631 = vst [vmem:[#allocation2 + $0x38] sm:$0xff] %v623_v13 }
 0x315   :  { %786 = shalt.err (!%p783_p4)
}
 0x316   :  { %s787_s25 = scalar_lea.hbm %s1200_s3, 1024 }
 0x317   :  { %p788_p5 = scmp.ne.s32.totalorder %s1200_s3, %s787_s25  ;;  %p791_p6 = scmp.lt.u32.totalorder %s787_s25, %s1200_s3 }
 0x319   :  { %p793_p7 = pnand %p791_p6, %p788_p5 }
 0x31b   :  { %796 = shalt.err (!%p793_p7)
}
 0x31c   :  { %s804_s30 = smov 128   ;;  %s805_s4 = smov 8  }
 0x31d   :  { %643 = dma.vmem_to_hbm [thread:$0]  %s638_s21, 1024, %s1200_s3, [#allocation3], %s804_s30, %s804_s30, %s805_s4  }
 0x31e   :  { %797 = dma.done.wait [#allocation3], 1024  }
 0x31f   :  { %798 = vsyncadd [#allocation3], 4294966272 }
 0x320   :  { %647 = vsyncpa [#allocation3], 1 }

</bundles_post_ra>
